<compile_context>
chip_gen: v5e
topology: v5e:2x2
jax: 0.10.0
libtpu: 0.0.40
codegen_flags: <defaults>
</compile_context>

<pallas_src>
import functools

import jax
import jax.numpy as jnp
import numpy as np
from jax.experimental import pallas as pl
from jax.experimental.pallas import tpu as pltpu

NEG_BIG = -1e30
_VMEM_LIMIT = 32 * 1024 * 1024


# ----------------------------------------------------------------------------
# Pass 1: per-relation projection (feat, el, er) - computed once per relation.
# ----------------------------------------------------------------------------
def _rgat_project_kernel(x_ref, w_ref, wlt_ref, wr_ref, feat_ref, el_ref, er_ref):
    x_bf = x_ref[...].astype(jnp.bfloat16)                     # (N, Din)
    w_bf = w_ref[...].astype(jnp.bfloat16)                     # (Din, HF)
    feat = jnp.dot(x_bf, w_bf, preferred_element_type=jnp.float32)
    feat_ref[...] = feat.astype(jnp.bfloat16)                  # stored bf16

    # el rows (H, N): attn_l is pre-folded into the projection weight on the
    # host (wl_t = einsum over W and attn_l, shape (H, Din)), so el comes from
    # one small matmul contracting Din. Runs once per relation (hoisted out of
    # the per-dst-tile loop), so its MXU-row under-utilisation is negligible.
    el = jax.lax.dot_general(wlt_ref[...].astype(jnp.bfloat16), x_bf,
                             (((1,), (1,)), ((), ())),
                             preferred_element_type=jnp.float32)   # (H, N)
    el_ref[...] = el

    # er columns (N, H): natural layout for the per-dst-tile slice.
    er = jnp.dot(x_bf, wr_ref[...].astype(jnp.bfloat16),
                 preferred_element_type=jnp.float32)               # (N, H)
    er_ref[...] = er


def rgat_project(x, W, wl_t, wr):
    R, Din, HF = W.shape
    N = x.shape[0]
    H = wl_t.shape[1]
    return pl.pallas_call(
        _rgat_project_kernel,
        out_shape=(jax.ShapeDtypeStruct((R, N, HF), jnp.bfloat16),
                   jax.ShapeDtypeStruct((R, H, N), jnp.float32),
                   jax.ShapeDtypeStruct((R, N, H), jnp.float32)),
        grid_spec=pltpu.PrefetchScalarGridSpec(
            num_scalar_prefetch=0,
            grid=(R,),
            in_specs=[
                pl.BlockSpec((N, Din), lambda r: (0, 0)),            # x
                pl.BlockSpec((None, Din, HF), lambda r: (r, 0, 0)),  # W
                pl.BlockSpec((None, H, Din), lambda r: (r, 0, 0)),   # W folded attn_l
                pl.BlockSpec((None, Din, H), lambda r: (r, 0, 0)),   # W folded attn_r
            ],
            out_specs=(
                pl.BlockSpec((None, N, HF), lambda r: (r, 0, 0)),    # feat bf16
                pl.BlockSpec((None, H, N), lambda r: (r, 0, 0)),     # el rows
                pl.BlockSpec((None, N, H), lambda r: (r, 0, 0)),     # er cols
            ),
        ),
        compiler_params=pltpu.CompilerParams(
            dimension_semantics=("parallel",),
            vmem_limit_bytes=_VMEM_LIMIT),
    )(x, W, wl_t, wr)


# ----------------------------------------------------------------------------
# Pass 2: GAT softmax + aggregation + relation sum + fused Linear(+ReLU).
# Grid = (dst_tiles, relations); relations accumulate into VMEM scratch.
# ----------------------------------------------------------------------------
def _rgat_gat_kernel(feat_ref, el_ref, er_ref, b_ref, adj_ref, lw_ref, lb_ref,
                     out_ref, acc_ref, *, num_heads, out_feats, relu):
    r = pl.program_id(1)

    @pl.when(r == 0)
    def _():
        acc_ref[...] = jnp.zeros_like(acc_ref)

    # Elementwise softmax chain kept in f32 (correct/fast on v5e; on v6e/v7x
    # this chain could run in bf16 for ~2x VPU/EUP throughput).
    adj_mask = adj_ref[...].astype(jnp.float32) > 0.0     # (tile_dst, N) bool
    feat_bf = feat_ref[...]                               # (N, HF) bf16
    el = el_ref[...]                                      # (H, N) f32
    er = er_ref[...]                                      # (tile_dst, H) f32
    bias = b_ref[...]                                     # (1, HF) f32

    for h in range(num_heads):
        lo, hi = h * out_feats, (h + 1) * out_feats
        e = er[:, h:h + 1] + el[h:h + 1, :]               # (tile_dst, N)
        e = jnp.maximum(e, 0.2 * e)                       # leaky_relu(0.2)
        # Pre-exp mask: row max is taken over real edges only (self-loops
        # guarantee at least one), so exp never over/underflows and the
        # denominator is >= 1 (safe for the approximate reciprocal).
        e = jnp.where(adj_mask, e, NEG_BIG)
        m = jnp.max(e, axis=1, keepdims=True)
        p = jnp.exp(e - m)                                # non-edges -> 0.0
        denom = jnp.sum(p, axis=1, keepdims=True)
        inv = pl.reciprocal(denom, approx=True)           # EUP slot
        # Per-head (tile_dst, N) @ (N, F) aggregation; denominator applied
        # after the matmul (p in [0, 1] is bf16-safe).
        ch = jnp.dot(p.astype(jnp.bfloat16), feat_bf[:, lo:hi],
                     preferred_element_type=jnp.float32) * inv
        acc_ref[:, lo:hi] += ch + bias[:, lo:hi]

    @pl.when(r == pl.num_programs(1) - 1)
    def _():
        y = jnp.dot(acc_ref[...].astype(jnp.bfloat16),
                    lw_ref[...].astype(jnp.bfloat16),
                    preferred_element_type=jnp.float32) + lb_ref[...]
        if relu:
            y = jnp.maximum(y, 0.0)
        out_ref[...] = y.astype(out_ref.dtype)


def _pick_tile_dst(n):
    # Prefer >= 2 dst tiles (so the "parallel" grid axis can shard across
    # v7x's two TensorCores) with a sublane dim that's a multiple of 32
    # (native int8 adjacency tiling) and a bounded (tile_dst, N) working set.
    for cand in (256, 128, 64, 32):
        if cand < n and n % cand == 0:
            return cand
    return n


def rgat_hetero_layer(x, adj_i8, W, attn_l, attn_r, bias, lw, lb, *,
                      num_heads, out_feats, relu, tile_dst=None):
    """x: (N, Din); adj_i8: (R, N, N) int8 (adj[r, dst, src]); W: (R, Din, H*F);
    attn_*: (R, H, F); bias: (R, 1, H*F); lw: (H*F, Dout); lb: (1, Dout).
    Returns (N, Dout) = Linear(sum_r GATConv_r(x)) (+ReLU if relu)."""
    R, N, _ = adj_i8.shape
    Din = x.shape[1]
    H, F = num_heads, out_feats
    HF = H * F
    Dout = lw.shape[1]
    if tile_dst is None:
        tile_dst = _pick_tile_dst(N)
    assert N % tile_dst == 0
    T = N // tile_dst

    # Host-side repack (tiny): fold attn vectors into the projection weights so
    # el/er come straight out of the shared projection pass.
    W4 = W.reshape(R, Din, H, F)
    wl_t = jnp.einsum('rdhf,rhf->rhd', W4, attn_l)   # (R, H, Din)
    wr = jnp.einsum('rdhf,rhf->rdh', W4, attn_r)     # (R, Din, H)

    feat, el, er = rgat_project(x, W, wl_t, wr)

    kernel = functools.partial(_rgat_gat_kernel, num_heads=H, out_feats=F,
                               relu=relu)
    return pl.pallas_call(
        kernel,
        out_shape=jax.ShapeDtypeStruct((N, Dout), jnp.float32),
        grid_spec=pltpu.PrefetchScalarGridSpec(
            num_scalar_prefetch=0,
            grid=(T, R),
            in_specs=[
                pl.BlockSpec((None, N, HF), lambda t, r: (r, 0, 0)),        # feat bf16
                pl.BlockSpec((None, H, N), lambda t, r: (r, 0, 0)),         # el rows
                pl.BlockSpec((None, tile_dst, H), lambda t, r: (r, t, 0)),  # er cols
                pl.BlockSpec((None, 1, HF), lambda t, r: (r, 0, 0)),        # bias
                pl.BlockSpec((None, tile_dst, N), lambda t, r: (r, t, 0)),  # adj int8
                pl.BlockSpec((HF, Dout), lambda t, r: (0, 0)),              # lin W
                pl.BlockSpec((1, Dout), lambda t, r: (0, 0)),               # lin b
            ],
            out_specs=pl.BlockSpec((tile_dst, Dout), lambda t, r: (t, 0)),
            scratch_shapes=[pltpu.VMEM((tile_dst, HF), jnp.float32)],
        ),
        compiler_params=pltpu.CompilerParams(
            dimension_semantics=("parallel", "arbitrary"),
            vmem_limit_bytes=_VMEM_LIMIT),
    )(feat, el, er, bias, adj_i8, lw, lb)


# ----------------------------------------------------------------------------
# RGAT forward (num_layers layers, returns h['user']).
# ----------------------------------------------------------------------------
def rgat_forward(blocks_adj, h_user, params, *, num_heads):
    num_layers = len(params["gat"])
    h = h_user
    for i in range(num_layers):
        gW, gal, gar, gb = params["gat"][i]
        lw, lb = params["lin"][i]
        out_feats = gal.shape[-1]
        h = rgat_hetero_layer(h, blocks_adj[i], gW, gal, gar, gb, lw, lb,
                              num_heads=num_heads, out_feats=out_feats,
                              relu=(i != num_layers - 1))
        # TODO(synk): dropout(0.1) omitted (inference semantics)
    return h


# ----------------------------------------------------------------------------
# Pure-JAX f32 reference (same math) for sanity checking.
# ----------------------------------------------------------------------------
def _ref_gat_layer(x, adj, W, al, ar, b, num_heads, out_feats):
    acc = 0.0
    for r in range(adj.shape[0]):
        feat = x @ W[r]                                   # (N, H*F)
        outs = []
        for h in range(num_heads):
            fh = feat[:, h * out_feats:(h + 1) * out_feats]
            el = jnp.sum(fh * al[r, h][None, :], axis=1)  # (N,) per src
            er = jnp.sum(fh * ar[r, h][None, :], axis=1)  # (N,) per dst
            e = er[:, None] + el[None, :]                 # (dst, src)
            e = jnp.where(e > 0, e, 0.2 * e)
            e = jnp.where(adj[r] > 0, e, NEG_BIG)
            p = jnp.exp(e - jnp.max(e, axis=1, keepdims=True))
            p = jnp.where(adj[r] > 0, p, 0.0)
            alpha = p / jnp.sum(p, axis=1, keepdims=True)
            outs.append(alpha @ fh + b[r, 0, h * out_feats:(h + 1) * out_feats])
        acc = acc + jnp.concatenate(outs, axis=1)
    return acc


def _ref_forward(blocks_adj, h, params, num_heads):
    L = len(params["gat"])
    for i in range(L):
        gW, gal, gar, gb = params["gat"][i]
        h = _ref_gat_layer(h, blocks_adj[i], gW, gal, gar, gb,
                           num_heads, gal.shape[-1])
        lw, lb = params["lin"][i]
        h = h @ lw + lb
        if i != L - 1:
            h = jnp.maximum(h, 0.0)
    return h


# ----------------------------------------------------------------------------
if __name__ == "__main__":
    # Small synthetic config (consistent with RGAT.__init__):
    #   in_size=16, hid_size=16, out_size=8, rel_names=['follows','likes'],
    #   num_layers=2, heads=2, N=64 'user' nodes (N=64 -> 2 dst tiles of 32).
    N, IN, HID, OUT = 64, 16, 16, 8
    HEADS, R, LAYERS = 2, 2, 2

    key = jax.random.PRNGKey(0)
    keys = iter(jax.random.split(key, 32))

    def nrm(shape, scale=0.1):
        return (scale * jax.random.normal(next(keys), shape)).astype(jnp.float32)

    dims = [(IN, HID), (HID, OUT)]   # layer0: in->hid, layer1: hid->out
    params = {"gat": [], "lin": []}
    for (din, dout) in dims:
        params["gat"].append((
            nrm((R, din, HEADS * dout)),       # GATConv fc weight per relation
            nrm((R, HEADS, dout)),             # attn_l
            nrm((R, HEADS, dout)),             # attn_r
            nrm((R, 1, HEADS * dout)),         # bias
        ))
        params["lin"].append((
            nrm((HEADS * dout, dout)),         # Linear(2*dout, dout) weight
            nrm((1, dout)),                    # Linear bias
        ))

    # Dense adjacency per layer/relation; adj[r, dst, src]; self-loops ensure
    # every destination has at least one in-edge (DGL zero-in-degree guard).
    # Stored as int8 to cut the O(N^2) DMA 4x.
    blocks_adj = []
    for _ in range(LAYERS):
        rnd = jax.random.bernoulli(next(keys), p=0.2, shape=(R, N, N))
        adj = jnp.minimum(rnd.astype(jnp.float32)
                          + jnp.eye(N, dtype=jnp.float32)[None], 1.0)
        blocks_adj.append(adj.astype(jnp.int8))

    # Input node features for node type 'user'.
    h_user = nrm((N, IN), scale=1.0)

    out = rgat_forward(blocks_adj, h_user, params, num_heads=HEADS)
    out = jax.block_until_ready(out)

    ref = _ref_forward(blocks_adj, h_user, params, HEADS)
    # Tolerance loosened vs. a pure-f32 path: kernel uses bf16 MXU operands
    # (f32 accumulate), a bf16-stored feat, and an approximate EUP reciprocal.
    np.testing.assert_allclose(np.asarray(out), np.asarray(ref),
                               rtol=5e-2, atol=1e-2)
    assert out.shape == (N, OUT)
    print("KERNEL_OK")
</pallas_src>

<mosaic_0001>
module attributes {stable_mosaic.version = 11 : i64} {
  func.func @_rgat_project_kernel(%arg0: i32, %arg1: memref<64x16xf32, #tpu.memory_space<vmem>>, %arg2: memref<1x16x32xf32, #tpu.memory_space<vmem>>, %arg3: memref<1x2x16xf32, #tpu.memory_space<vmem>>, %arg4: memref<1x16x2xf32, #tpu.memory_space<vmem>>, %arg5: memref<1x64x32xbf16, #tpu.memory_space<vmem>>, %arg6: memref<1x2x64xf32, #tpu.memory_space<vmem>>, %arg7: memref<1x64x2xf32, #tpu.memory_space<vmem>>) attributes {dimension_semantics = [#tpu.dimension_semantics<parallel>], iteration_bounds = array<i64: 2>, scalar_prefetch = 0 : i64, scratch_operands = 0 : i64, tpu.core_type = #tpu.core_type<tc>, window_params = [{pipeline_mode = #tpu.pipeline_mode<synchronous>, transform_indices = @transform_0, window_bounds = array<i64: 64, 16>}, {transform_indices = @transform_1, window_bounds = array<i64: 1, 16, 32>}, {transform_indices = @transform_2, window_bounds = array<i64: 1, 2, 16>}, {transform_indices = @transform_3, window_bounds = array<i64: 1, 16, 2>}, {transform_indices = @transform_4, window_bounds = array<i64: 1, 64, 32>}, {transform_indices = @transform_5, window_bounds = array<i64: 1, 2, 64>}, {transform_indices = @transform_6, window_bounds = array<i64: 1, 64, 2>}]} {
    %c0 = arith.constant 0 : index
    %c0_0 = arith.constant 0 : index
    %0 = vector.load %arg1[%c0, %c0_0] : memref<64x16xf32, #tpu.memory_space<vmem>>, vector<64x16xf32>
    %1 = arith.truncf %0 : vector<64x16xf32> to vector<64x16xbf16>
    %c0_1 = arith.constant 0 : index
    %c0_2 = arith.constant 0 : index
    %c0_3 = arith.constant 0 : index
    %2 = vector.load %arg2[%c0_1, %c0_2, %c0_3] : memref<1x16x32xf32, #tpu.memory_space<vmem>>, vector<1x16x32xf32>
    %3 = vector.shape_cast %2 : vector<1x16x32xf32> to vector<16x32xf32>
    %4 = arith.truncf %3 : vector<16x32xf32> to vector<16x32xbf16>
    %cst = arith.constant dense<0.000000e+00> : vector<64x32xf32>
    %5 = tpu.matmul %1, %4, %cst {dimension_numbers = #tpu.dot_dimension_numbers<[1], [0], [0], [1], [0, 0, 1, 1], [], []>} : vector<64x16xbf16>, vector<16x32xbf16>, vector<64x32xf32> -> vector<64x32xf32>
    %6 = arith.truncf %5 : vector<64x32xf32> to vector<64x32xbf16>
    %c0_4 = arith.constant 0 : index
    %c0_5 = arith.constant 0 : index
    %c0_6 = arith.constant 0 : index
    %7 = vector.load %arg5[%c0_4, %c0_5, %c0_6] : memref<1x64x32xbf16, #tpu.memory_space<vmem>>, vector<1x64x32xbf16>
    %8 = vector.shape_cast %7 : vector<1x64x32xbf16> to vector<64x32xbf16>
    %9 = vector.shape_cast %6 : vector<64x32xbf16> to vector<1x64x32xbf16>
    tpu.vector_store %arg5[%c0_4, %c0_5, %c0_6], %9 {strides = array<i32>} : memref<1x64x32xbf16, #tpu.memory_space<vmem>>, vector<1x64x32xbf16>,
    %c0_7 = arith.constant 0 : index
    %c0_8 = arith.constant 0 : index
    %c0_9 = arith.constant 0 : index
    %10 = vector.load %arg3[%c0_7, %c0_8, %c0_9] : memref<1x2x16xf32, #tpu.memory_space<vmem>>, vector<1x2x16xf32>
    %11 = vector.shape_cast %10 : vector<1x2x16xf32> to vector<2x16xf32>
    %12 = arith.truncf %11 : vector<2x16xf32> to vector<2x16xbf16>
    %cst_10 = arith.constant dense<0.000000e+00> : vector<2x64xf32>
    %13 = tpu.matmul %12, %1, %cst_10 {dimension_numbers = #tpu.dot_dimension_numbers<[1], [1], [0], [0], [0, 0, 1, 0], [], []>} : vector<2x16xbf16>, vector<64x16xbf16>, vector<2x64xf32> -> vector<2x64xf32>
    %c0_11 = arith.constant 0 : index
    %c0_12 = arith.constant 0 : index
    %c0_13 = arith.constant 0 : index
    %14 = vector.load %arg6[%c0_11, %c0_12, %c0_13] : memref<1x2x64xf32, #tpu.memory_space<vmem>>, vector<1x2x64xf32>
    %15 = vector.shape_cast %14 : vector<1x2x64xf32> to vector<2x64xf32>
    %16 = vector.shape_cast %13 : vector<2x64xf32> to vector<1x2x64xf32>
    tpu.vector_store %arg6[%c0_11, %c0_12, %c0_13], %16 {strides = array<i32>} : memref<1x2x64xf32, #tpu.memory_space<vmem>>, vector<1x2x64xf32>,
    %c0_14 = arith.constant 0 : index
    %c0_15 = arith.constant 0 : index
    %c0_16 = arith.constant 0 : index
    %17 = vector.load %arg4[%c0_14, %c0_15, %c0_16] : memref<1x16x2xf32, #tpu.memory_space<vmem>>, vector<1x16x2xf32>
    %18 = vector.shape_cast %17 : vector<1x16x2xf32> to vector<16x2xf32>
    %19 = arith.truncf %18 : vector<16x2xf32> to vector<16x2xbf16>
    %cst_17 = arith.constant dense<0.000000e+00> : vector<64x2xf32>
    %20 = tpu.matmul %1, %19, %cst_17 {dimension_numbers = #tpu.dot_dimension_numbers<[1], [0], [0], [1], [0, 0, 1, 1], [], []>} : vector<64x16xbf16>, vector<16x2xbf16>, vector<64x2xf32> -> vector<64x2xf32>
    %c0_18 = arith.constant 0 : index
    %c0_19 = arith.constant 0 : index
    %c0_20 = arith.constant 0 : index
    %21 = vector.load %arg7[%c0_18, %c0_19, %c0_20] : memref<1x64x2xf32, #tpu.memory_space<vmem>>, vector<1x64x2xf32>
    %22 = vector.shape_cast %21 : vector<1x64x2xf32> to vector<64x2xf32>
    %23 = vector.shape_cast %20 : vector<64x2xf32> to vector<1x64x2xf32>
    tpu.vector_store %arg7[%c0_18, %c0_19, %c0_20], %23 {strides = array<i32>} : memref<1x64x2xf32, #tpu.memory_space<vmem>>, vector<1x64x2xf32>,
    return
  }
  func.func @transform_0(%arg0: i32) -> (i32, i32) {
    %c0_i32 = arith.constant 0 : i32
    %c0_i32_0 = arith.constant 0 : i32
    %c0_i32_1 = arith.constant 0 : i32
    return %c0_i32, %c0_i32_0 : i32, i32
  }
  func.func @transform_1(%arg0: i32) -> (i32, i32, i32) {
    %c0_i32 = arith.constant 0 : i32
    %c0_i32_0 = arith.constant 0 : i32
    %c0_i32_1 = arith.constant 0 : i32
    return %arg0, %c0_i32, %c0_i32_0 : i32, i32, i32
  }
  func.func @transform_2(%arg0: i32) -> (i32, i32, i32) {
    %c0_i32 = arith.constant 0 : i32
    %c0_i32_0 = arith.constant 0 : i32
    %c0_i32_1 = arith.constant 0 : i32
    return %arg0, %c0_i32, %c0_i32_0 : i32, i32, i32
  }
  func.func @transform_3(%arg0: i32) -> (i32, i32, i32) {
    %c0_i32 = arith.constant 0 : i32
    %c0_i32_0 = arith.constant 0 : i32
    %c0_i32_1 = arith.constant 0 : i32
    return %arg0, %c0_i32, %c0_i32_0 : i32, i32, i32
  }
  func.func @transform_4(%arg0: i32) -> (i32, i32, i32) {
    %c0_i32 = arith.constant 0 : i32
    %c0_i32_0 = arith.constant 0 : i32
    %c0_i32_1 = arith.constant 0 : i32
    return %arg0, %c0_i32, %c0_i32_0 : i32, i32, i32
  }
  func.func @transform_5(%arg0: i32) -> (i32, i32, i32) {
    %c0_i32 = arith.constant 0 : i32
    %c0_i32_0 = arith.constant 0 : i32
    %c0_i32_1 = arith.constant 0 : i32
    return %arg0, %c0_i32, %c0_i32_0 : i32, i32, i32
  }
  func.func @transform_6(%arg0: i32) -> (i32, i32, i32) {
    %c0_i32 = arith.constant 0 : i32
    %c0_i32_0 = arith.constant 0 : i32
    %c0_i32_1 = arith.constant 0 : i32
    return %arg0, %c0_i32, %c0_i32_0 : i32, i32, i32
  }
}

</mosaic_0001>

<bundles_post_ra>
// kernel: tpu_custom_call.1
= control target key start
LH: loop header
LB: loop body
LE: loop exit
PB: predicated region body
PF: predicated region fallthrough
CT: control target
= control target key end

     0   :  { %12 = vsyncpa [#allocation3], 0  ;;  %s963_s0 = inlined_call_operand.vmem [shape: f32[64,16], index: 0, kind: input, shape index: {}]   ;;  %s964_s1 = inlined_call_operand.vmem [shape: f32[2,16,32], index: 1, kind: input, shape index: {}]   ;;  %s965_s2 = inlined_call_operand.vmem [shape: f32[2,2,16], index: 2, kind: input, shape index: {}]   ;;  %s966_s3 = inlined_call_operand.vmem [shape: f32[2,16,2], index: 3, kind: input, shape index: {}]   ;;  %s967_s4 = inlined_call_operand.vmem [shape: bf16[2,64,32], index: 4, kind: output, shape index: {0}]   ;;  %s968_s5 = inlined_call_operand.hbm [shape: f32[2,2,64], index: 5, kind: output, shape index: {1}]   ;;  %s969_s6 = inlined_call_operand.vmem [shape: f32[2,64,2], index: 6, kind: output, shape index: {2}]  }
   0x1   :  { %14 = vsyncpa [#allocation3 + $0x1], 0  ;;  %s784_s21 = smov 0   ;;  %s786_s22 = smov 0  }
   0x2   :  { %s788_s23 = smov 0   ;;  %s790_s24 = smov 0  }
   0x3 LB: > { %s805_s25 = sadd.s32 4294967295, %s747_s24   ;;  %s613_s26 = sadd.s32 4294967294, %s747_s24   ;;  %s747_s24 = sphi %s790_s24, %s975_s24   ;;  %s743_s23 = sphi %s788_s23, %s974_s23   ;;  %s739_s22 = sphi %s786_s22, %s973_s22   ;;  %s735_s21 = sphi %s784_s21, %s972_s21  }
   0x4   : > { %s809_s27 = sadd.s32 1, %s747_s24   ;;  %s152_s28 = sadd.s32 1, %s743_s23 }
   0x5   : > { %s149_s29 = ssub.s32 %s747_s24, %s809_s27  ;;  %p162_p0 = scmp.ne.s32.totalorder %s743_s23, %s739_s22 }
   0x6   : > { %p150_p1 = scmp.eq.s32.totalorder %s149_s29, 0  ;;  %p163_p2 = scmp.eq.s32.totalorder %s805_s25, 1 }
   0x7   : > { %p168_p3 = scmp.ne.s32.totalorder %s739_s22, %s735_s21  ;;  %p169_p4 = scmp.eq.s32.totalorder %s613_s26, 1 }
   0x8   : > { %s820_s30 = scalar_select %p150_p1, %s743_s23, %s152_s28  }
   0x9   : > { %p822_p5 = por %p163_p2, %p162_p0  ;;  %p826_p6 = por %p169_p4, %p168_p3 }
   0xa   : > { %p616_p7 = scmp.ge.s32.totalorder %s747_s24, 1  ;;  %p239_p8 = scmp.lt.s32.totalorder %s747_s24, 3 }
   0xc   : > { %p240_p9 = pnand %p616_p7, %p239_p8 }
   0xd   : > { %p288_p10 = scmp.lt.s32.totalorder (!%p240_p9), %s805_s25, 1  ;;  %s637_s17 = sshll.u32 (!%p240_p9), %s805_s25, 1 }
   0xe   : > { %243 = sbr.rel (%p240_p9) target bundleno = 204 (0xcc), region = 36  ;;  %s472_s26 = scalar_lea.hbm (!%p240_p9), %s968_s5, %s637_s17 }
   0xf   : > { %s476_s9 = sshll.u32 (!%p240_p9), %s472_s26, 4  ;;  %s705_s17 = scalar_lea.hbm (!%p240_p9), %s968_s5, 4  ;;  %s477_s9 = int_to_ptr.hbm [resolvable:$true] %s476_s9 }
  0x10   : > { %s699_s10 = sshra.s32 (!%p240_p9), %s477_s9, 4  ;;  %s700_s10 = int_to_ptr.hbm [resolvable:$true] %s699_s10 }
  0x11   : > { %p706_p0 = scmp.lt.s32.totalorder (!%p240_p9), %s700_s10, %s968_s5 }
  0x13   : > { %v319_v0 = vld [vmem:[%s963_s0 + $0x30] sm:$0xff]  ;;  %vm328_vm0 = vcmask 130048   ;;  %v320_v1 = vld [vmem:[%s963_s0 + $0x38] sm:$0xff]  ;;  %s840_s13 = scalar_select %p288_p10, %s805_s25, 1  ;;  %v317_v3 = vld [vmem:[%s963_s0 + $0x20] sm:$0xff]  ;;  %vm378_vm1 = vcmask 257024  }
  0x14   : > { %v324_v2 = vpack.c.bf16 %v320_v1, %v319_v0  ;;  %v318_v4 = vld [vmem:[%s963_s0 + $0x28] sm:$0xff]  ;;  %v315_v5 = vld [vmem:[%s963_s0 + $0x10] sm:$0xff]  ;;  %v316_v7 = vld [vmem:[%s963_s0 + $0x18] sm:$0xff]  ;;  %vm439_vm2 = vcmask 15360   ;;  %vm405_vm3 = vcmask 517120  }
  0x15   : > { %s640_s18 = sshll.u32 %s840_s13, 4  ;;  %v313_v8 = vld [vmem:[%s963_s0] sm:$0xff]  ;;  %v314_v9 = vld [vmem:[%s963_s0 + $0x8] sm:$0xff]  ;;  %v323_v12 = vpack.c.bf16 %v318_v4, %v317_v3  ;;  %v322_v17 = vpack.c.bf16 %v316_v7, %v315_v5  ;;  %s643_s12 = sshll.u32 %s840_s13, 6 }
  0x16   : > { %v339_v6 = vsel %vm328_vm0, %v324_v2, 0  ;;  %s292_s29 = scalar_lea.vmem %s964_s1, %s640_s18  ;;  %s301_s19 = scalar_lea.vmem %s966_s3, %s640_s18  ;;  %v321_v18 = vpack.c.bf16 %v314_v9, %v313_v8 }
  0x17   : > { %396 = vmatpush.bf16.xpose.msra.mxu1 %v339_v6  ;;  %v325_v10 = vld [vmem:[%s292_s29] sm:$0xff]  ;;  %v326_v11 = vld [vmem:[%s292_s29 + $0x8] sm:$0xff]  ;;  %v336_v19 = vsel %vm328_vm0, %v323_v12, 0  ;;  %v333_v20 = vsel %vm328_vm0, %v322_v17, 0  ;;  %s620_s18 = sshll.u32 %s840_s13, 1  ;;  %s642_s29 = sshll.u32 %s840_s13, 5 }
  0x18   : > { %v327_v13 = vpack.c.bf16 %v326_v11, %v325_v10  ;;  %v407_v14 = vld [vmem:[%s301_s19] sm:$0xff]  ;;  %v408_v15 = vld [vmem:[%s301_s19 + $0x8] sm:$0xff]  ;;  %v330_v21 = vsel %vm328_vm0, %v321_v18, 0  ;;  %s296_s28 = scalar_lea.vmem %s965_s2, %s620_s18  ;;  %s888_s11 = scalar_lea.vmem %s967_s4, %s642_s29 }
  0x19   : > { %v409_v16 = vpack.c.bf16 %v408_v15, %v407_v14  ;;  %v387_v22 = vld [vmem:[%s296_s28] sm:$0x3]  ;;  %s896_s16 = scalar_lea.vmem %s969_s6, %s643_s12  ;;  %s278_s13 = sand.u32 1, %s739_s22  }
  0x1a   : > { %644 = vmatpush.bf16.msra.mxu3 %v327_v13  ;;  %348 = vmatpush.bf16.msra.mxu0 %v327_v13  ;;  %v388_v23 = vpack.c.bf16 %v387_v22, %v387_v22  ;;  %s617_s19 = sshll.u32 %s278_s13, 1  ;;  %s454_s25 = scalar_lea.sflag [#allocation3], %s278_s13 }
  0x1b   : > { %645 = vmatpush.bf16.msra.mxu2 %v409_v16  ;;  %s280_s28 = scalar_lea.vmem [#allocation2], %s617_s19  ;;  %s701_s12 = scalar_lea.hbm %s700_s10, 2 }
  0x1c   : > { %s915_s29 = sshll.u32 %s280_s28, 4  ;;  %p702_p11 = scmp.ne.s32.totalorder %s700_s10, %s701_s12  ;;  %s475_s29 = int_to_ptr.vmem [resolvable:$true] %s915_s29 }
  0x1d   : > { %628 = vmatmul.msk.bf16.vlgmr.msra.gmra.mxu3 %vm328_vm0, %v322_v17  ;;  %627 = vmatmul.msk.bf16.vlgmr.msra.gmra.mxu0 %vm328_vm0, %v321_v18  ;;  %p707_p1 = scmp.lt.s32.totalorder %s705_s17, %s701_s12 }
  0x1e   : > { %417 = vmatpush.bf16.msrb.mxu0 %v409_v16  ;;  %633 = vmatmul.msk.bf16.vlgmr.msra.gmra.mxu2 %vm328_vm0, %v322_v17  ;;  %p703_p12 = pnand %p702_p11, %p822_p5 }
  0x1f   : > { %397 = vmatpush.bf16.xpose.msra.mxu1 %v336_v19  ;;  %p708_p2 = por %p707_p1, %p706_p0 }
  0x20   : > { %p704_p13 = pneg %p703_p12 }
  0x22   : > { %p709_p3 = pnand %p708_p2, %p704_p13 }
  0x27   : > { %398 = vmatpush.bf16.xpose.msra.mxu1 %v333_v20 }
  0x2d   : > { %629 = vmatmul.msk.bf16.gmra.mxu3 %vm328_vm0, %v323_v12  ;;  %632 = vmatmul.msk.bf16.vlgmr.msrb.gmra.mxu0 %vm328_vm0, %v321_v18 }
  0x2e   : > { %634 = vmatmul.msk.bf16.gmra.mxu2 %vm328_vm0, %v323_v12 }
  0x2f   : > { %399 = vmatpush.bf16.xpose.msra.mxu1 %v330_v21 }
  0x36   : > { %631 = vmatmul.msk.bf16.vlgmr.msra.gmra.mxu1 %vm328_vm0, %v388_v23 }
  0x3d   : > { %630 = vmatmul.msk.bf16.gmra.mxu3 %vm328_vm0, %v324_v2 }
  0x3e   : > { %635 = vmatmul.msk.bf16.gmra.mxu2 %vm328_vm0, %v324_v2 }
  0x9a   : > { %v350_v24 = vpop.f32.mrf.mxu0 }
  0x9b   : > { %v370_v25 = vpack.c.bf16 %v350_v24, %v350_v24 }
  0x9d   : > { %379 = vst.msk [vmem:[%s888_s11] sm:$0xf] %vm378_vm1, %v370_v25 }
  0xa0   : > { %v355_v26 = vpop.f32.mrf.mxu3 }
  0xa1   : > { %v372_v27 = vpack.c.bf16 %v355_v26, %v355_v26  ;;  %v424_v28 = vpop.f32.mrf.mxu2 }
  0xa2   : > { %442 = vst.msk [vmem:[%s896_s16 + $0x10] sm:$0xff] %vm439_vm2, %v424_v28  ;;  %v352_v29 = vpop.f32.mrf.mxu0 }
  0xa3   : > { %381 = vst.msk [vmem:[%s888_s11 + $0x8] sm:$0xf] %vm378_vm1, %v372_v27  ;;  %v371_v30 = vpack.c.bf16 %v352_v29, %v352_v29 }
  0xa5   : > { %380 = vst.msk [vmem:[%s888_s11 + $0x4] sm:$0xf] %vm378_vm1, %v371_v30 }
  0xa8   : > { %v357_v31 = vpop.f32.mrf.mxu3 }
  0xa9   : > { %v373_v32 = vpack.c.bf16 %v357_v31, %v357_v31  ;;  %v426_v33 = vpop.f32.mrf.mxu2 }
  0xaa   : > { %443 = vst.msk [vmem:[%s896_s16 + $0x18] sm:$0xff] %vm439_vm2, %v426_v33  ;;  %v419_v34 = vpop.f32.mrf.mxu0 }
  0xab   : > { %382 = vst.msk [vmem:[%s888_s11 + $0xc] sm:$0xf] %vm378_vm1, %v373_v32 }
  0xac   : > { %440 = vst.msk [vmem:[%s896_s16] sm:$0xff] %vm439_vm2, %v419_v34 }
  0xb0   : > { %v360_v35 = vpop.f32.mrf.mxu3 }
  0xb1   : > { %v374_v36 = vpack.c.bf16 %v360_v35, %v360_v35  ;;  %v429_v37 = vpop.f32.mrf.mxu2 }
  0xb2   : > { %444 = vst.msk [vmem:[%s896_s16 + $0x20] sm:$0xff] %vm439_vm2, %v429_v37  ;;  %v421_v39 = vpop.f32.mrf.mxu0 }
  0xb3   : > { %v401_v38 = vpop.f32.mrf.mxu1  ;;  %383 = vst.msk [vmem:[%s888_s11 + $0x10] sm:$0xf] %vm378_vm1, %v374_v36 }
  0xb4   : > { %406 = vst.msk [vmem:[%s280_s28] sm:$0x3] %vm405_vm3, %v401_v38 }
  0xb5   : > { %441 = vst.msk [vmem:[%s896_s16 + $0x8] sm:$0xff] %vm439_vm2, %v421_v39 }
  0xb6   : > { %712 = shalt.err (!%p709_p3)
}
  0xb7   : > { %646 = dma.vmem_to_hbm [thread:$0]  (%p822_p5), %s475_s29, 32, %s477_s9, %s454_s25  }
  0xb8   : > { %v362_v40 = vpop.f32.mrf.mxu3 }
  0xb9   : > { %v375_v41 = vpack.c.bf16 %v362_v40, %v362_v40  ;;  %v431_v42 = vpop.f32.mrf.mxu2 }
  0xba   : > { %445 = vst.msk [vmem:[%s896_s16 + $0x28] sm:$0xff] %vm439_vm2, %v431_v42 }
  0xbb   : > { %v403_v43 = vpop.f32.mrf.mxu1  ;;  %384 = vst.msk [vmem:[%s888_s11 + $0x14] sm:$0xf] %vm378_vm1, %v375_v41 }
  0xc0   : > { %v365_v44 = vpop.f32.mrf.mxu3 }
  0xc1   : > { %v376_v45 = vpack.c.bf16 %v365_v44, %v365_v44  ;;  %v434_v46 = vpop.f32.mrf.mxu2 }
  0xc2   : > { %446 = vst.msk [vmem:[%s896_s16 + $0x30] sm:$0xff] %vm439_vm2, %v434_v46 }
  0xc3   : > { %385 = vst.msk [vmem:[%s888_s11 + $0x18] sm:$0xf] %vm378_vm1, %v376_v45 }
  0xc8   : > { %v367_v47 = vpop.f32.mrf.mxu3 }
  0xc9   : > { %v377_v48 = vpack.c.bf16 %v367_v47, %v367_v47  ;;  %v436_v49 = vpop.f32.mrf.mxu2 }
  0xca   : > { %447 = vst.msk [vmem:[%s896_s16 + $0x38] sm:$0xff] %vm439_vm2, %v436_v49 }
  0xcb   : > { %386 = vst.msk [vmem:[%s888_s11 + $0x1c] sm:$0xf] %vm378_vm1, %v377_v48 }
  0xcc PF: > { %p652_p4 = scmp.ge.s32.totalorder %s747_s24, 2  ;;  %s499_s7 = sand.u32 1, %s735_s21  }
  0xcd   : > { %s500_s13 = scalar_lea.sflag [#allocation3], %s499_s7 }
  0xce   : > { %p649_p5 = pnand %p652_p4, %p826_p6 }
  0xd0   : > { %p650_p7 = pneg %p649_p5 }
  0xd2   : > { %730 = dma.done.wait (%p650_p7), %s500_s13, 32  }
  0xd3   : > { %732 = vsyncadd (%p650_p7), %s500_s13, 4294967264  ;;  %p17_p8 = scmp.ge.s32.totalorder %s809_s27, 4   ;;  %s972_s21 = smov %s739_s22 }
  0xd4   : > { %s973_s22 = smov %s743_s23  ;;  %s974_s23 = smov %s820_s30 }
  0xd5   : > { %s975_s24 = smov %s809_s27  ;;  %19 = sbr.rel (!%p17_p8) target bundleno = 3 (0x3), region = 101 }
  0xda   :  { %514 = vsyncpa [#allocation3], 1 }
  0xdb   :  { %516 = vsyncpa [#allocation3 + $0x1], 1 }

</bundles_post_ra>
